<compile_context>
chip_gen: v5e
topology: v5e:2x2
jax: 0.10.0
libtpu: 0.0.40
codegen_flags: <defaults>
</compile_context>

<pallas_src>
import jax
import jax.numpy as jnp
import numpy as np
from jax import lax
from jax.experimental import pallas as pl
from jax.experimental.pallas import tpu as pltpu


# ----------------------------- Pallas kernels ------------------------------ #

def _conv_bn_relu_kernel(xpat_ref, w_ref, fbias_ref, o_ref):
    # Conv3x3 (+bias) + BN(eval) + ReLU; BN scale folded into w, bias+shift into fbias.
    raw = jnp.dot(xpat_ref[...], w_ref[...], preferred_element_type=jnp.float32)
    o_ref[...] = jnp.maximum(raw + fbias_ref[...], 0.0).astype(o_ref.dtype)


def _pconv_bn_relu_kernel(xpat_ref, ratio_ref, w_ref, rsel_ref, bscale_ref,
                          shift_ref, o_ref):
    # PartialConv2d + BN(eval) + ReLU on pixel-packed rows.
    #   raw       : conv(image*mask) with BN scale folded into w  (one MXU GEMM)
    #   ratio_rep : per-pixel ratio expanded to packed lanes via a selector GEMM
    #   update    : ratio > 0   (exact: ratio already includes the update factor)
    raw = jnp.dot(xpat_ref[...], w_ref[...], preferred_element_type=jnp.float32)
    ratio_rep = jnp.dot(ratio_ref[...], rsel_ref[...],
                        preferred_element_type=jnp.float32)
    upd = (ratio_rep > 0.0).astype(jnp.float32)
    out = raw * ratio_rep + bscale_ref[...] * upd + shift_ref[...]
    o_ref[...] = jnp.maximum(out, 0.0).astype(o_ref.dtype)


# ------------------------------- helpers ----------------------------------- #

def _round_up(x, m):
    return (x + m - 1) // m * m


def _pack_factor(cout):
    # pixels packed per 128-lane output row (only when it tiles 128 exactly).
    if cout <= 128 and 128 % cout == 0:
        return 128 // cout
    return 1


def _im2col_3x3(x_nhwc):
    n, h, w, c = x_nhwc.shape
    xp = jnp.pad(x_nhwc, ((0, 0), (1, 1), (1, 1), (0, 0)))
    cols = [xp[:, i:i + h, j:j + w, :] for i in range(3) for j in range(3)]
    p = jnp.stack(cols, axis=3)                       # (N, H, W, 9, C)
    return p.reshape(n * h * w, 9 * c)                # row-major: pixel-major rows


def _bn_fold(gamma, beta, mean, var, eps):
    inv_std = 1.0 / jnp.sqrt(var + eps)
    scale = gamma * inv_std
    shift = beta - mean * scale
    return scale, shift


def _block_diag_weights(w, scale, g, width):
    # (Cout, Cin, 3, 3) -> block-diagonal (g*9*Cin, width) bf16 with BN scale folded.
    cout, cin = w.shape[0], w.shape[1]
    kcol = 9 * cin
    wmat = jnp.transpose(w, (2, 3, 1, 0)).reshape(kcol, cout) * scale[None, :]
    eye = jnp.eye(g, dtype=wmat.dtype)
    wbig = jnp.einsum('ab,kc->akbc', eye, wmat).reshape(g * kcol, g * cout)
    return jnp.pad(wbig, ((0, 0), (0, width - g * cout))).astype(jnp.bfloat16)


def _tile_row(vec, g, width):
    row = jnp.tile(vec.astype(jnp.float32), g)
    return jnp.pad(row, (0, width - row.shape[0])).reshape(1, width)


def _vmem_caps():
    try:
        cap = int(pltpu.get_tpu_info().vmem_capacity_bytes)
    except Exception:
        cap = 64 * 1024 * 1024                       # conservative (v7x-sized)
    ceiling = (cap * 3) // 4                          # never request >75% of physical
    return ceiling - (6 << 20), ceiling               # (budget, limit ceiling)


def _choose_tiling(m_rows, g, kcol, width, tm_max, extra_col_bytes_per_pixel=0.0):
    """Pick a pixel-row tile tm (multiple of the row quantum), padded M, vmem limit."""
    rq = max(128, 16 * g)                 # keeps packed rows a multiple of 16 (bf16 tile)
    m_al = _round_up(max(m_rows, 1), rq)
    nblocks = m_al // rq

    budget, ceiling = _vmem_caps()
    # double-buffered bytes per pixel row: bf16 patches + bf16 packed output + aux col
    per_pixel = 2.0 * (kcol * 2) + 2.0 * (width * 2) / g + extra_col_bytes_per_pixel
    fixed = 2 * (g * kcol) * width * 2 + (1 << 20)    # weights (dbuf) + rows/slack
    max_rows = int(max(rq, (budget - fixed) // per_pixel))

    bpt = max(1, min(tm_max // rq, max_rows // rq))
    if nblocks >= 2:                                   # >=2 tiles => v7x megacore shards
        bpt = min(bpt, max(1, nblocks // 2))
    tm = bpt * rq
    m_pad = _round_up(m_al, tm)
    need = int(per_pixel * tm + fixed)
    vmem_limit = int(min(ceiling, max(need + (8 << 20), 32 << 20)))
    return tm, m_pad, vmem_limit


# -------------------------- fused conv wrappers ----------------------------- #

def _conv3x3_bn_relu(x_nhwc, w, b, gamma, beta, mean, var, *, eps, tm_max):
    """Conv2d(3x3,'same') + BN2d(eval) + ReLU.  Returns bf16 NHWC."""
    n, h, wd, cin = x_nhwc.shape
    cout = w.shape[0]
    kcol = 9 * cin
    g = _pack_factor(cout)
    gk = g * kcol
    width = _round_up(g * cout, 128)

    scale, shift = _bn_fold(gamma, beta, mean, var, eps)
    wbig = _block_diag_weights(w, scale, g, width)                  # (gk, width) bf16
    fbias = _tile_row(b * scale + shift, g, width)                  # (1, width) f32

    pat = _im2col_3x3(x_nhwc.astype(jnp.bfloat16))                  # (M, kcol) bf16
    m_rows = n * h * wd
    tm, m_pad, vmem_limit = _choose_tiling(m_rows, g, kcol, width, tm_max)
    pat = jnp.pad(pat, ((0, m_pad - m_rows), (0, 0)))
    pat = pat.reshape(m_pad // g, gk)                 # free view: g pixels per row
    tm_p = tm // g

    ce = pl.CostEstimate(
        flops=int(2 * (m_pad // g) * gk * width),
        transcendentals=0,
        bytes_accessed=int(m_pad * kcol * 2 + (m_pad // g) * width * 2
                           + gk * width * 2))

    out = pl.pallas_call(
        _conv_bn_relu_kernel,
        out_shape=jax.ShapeDtypeStruct((m_pad // g, width), jnp.bfloat16),
        grid_spec=pltpu.PrefetchScalarGridSpec(
            num_scalar_prefetch=0,
            grid=(m_pad // tm,),
            in_specs=[
                pl.BlockSpec((tm_p, gk), lambda i: (i, 0)),         # packed patches
                pl.BlockSpec((gk, width), lambda i: (0, 0)),        # block-diag weights
                pl.BlockSpec((1, width), lambda i: (0, 0)),         # folded bias row
            ],
            out_specs=pl.BlockSpec((tm_p, width), lambda i: (i, 0)),
        ),
        compiler_params=pltpu.CompilerParams(
            dimension_semantics=("parallel",),
            vmem_limit_bytes=vmem_limit),
        cost_estimate=ce,
    )(pat, wbig, fbias)

    out = out[:, :g * cout].reshape(m_pad, cout)[:m_rows]
    return out.reshape(n, h, wd, cout)                              # bf16 NHWC


def _pconv3x3_bn_relu(x_masked_nhwc, ratio_flat, w, b, gamma, beta, mean, var,
                      *, eps, tm_max):
    """PartialConv2d(3x3,'same',multi_channel) + BN2d(eval) + ReLU (bf16 NHWC out).

    x_masked_nhwc is already image*mask; ratio_flat is the per-pixel
    slide_winsize/(msum+eps)*update column (exact f32, computed in the wrapper).
    """
    n, h, wd, cin = x_masked_nhwc.shape
    cout = w.shape[0]
    kcol = 9 * cin
    g = _pack_factor(cout)
    gk = g * kcol
    width = _round_up(g * cout, 128)

    scale, shift = _bn_fold(gamma, beta, mean, var, eps)
    wbig = _block_diag_weights(w, scale, g, width)                  # (gk, width) bf16
    bscale_row = _tile_row(b * scale, g, width)                     # (1, width) f32
    shift_row = _tile_row(shift, g, width)                          # (1, width) f32

    # repeat-selector: (g, width) with R[a, a*cout + c] = 1 expands the per-pixel
    # ratio column to the packed lane layout via one tiny MXU GEMM in-kernel.
    rsel = jnp.zeros((g, width), jnp.float32).at[
        jnp.repeat(jnp.arange(g), cout), jnp.arange(g * cout)].set(1.0)

    pat = _im2col_3x3(x_masked_nhwc.astype(jnp.bfloat16))           # (M, kcol) bf16
    m_rows = n * h * wd
    tm, m_pad, vmem_limit = _choose_tiling(
        m_rows, g, kcol, width, tm_max,
        extra_col_bytes_per_pixel=1024.0 / g)         # lane-padded (tm/g, g) f32, dbuf
    pat = jnp.pad(pat, ((0, m_pad - m_rows), (0, 0))).reshape(m_pad // g, gk)
    ratio = jnp.pad(ratio_flat.astype(jnp.float32), (0, m_pad - m_rows))
    ratio = ratio.reshape(m_pad // g, g)
    tm_p = tm // g

    ce = pl.CostEstimate(
        flops=int(2 * (m_pad // g) * gk * width + 2 * (m_pad // g) * g * width),
        transcendentals=0,
        bytes_accessed=int(m_pad * kcol * 2 + (m_pad // g) * width * 2
                           + m_pad * 4 + gk * width * 2))

    out = pl.pallas_call(
        _pconv_bn_relu_kernel,
        out_shape=jax.ShapeDtypeStruct((m_pad // g, width), jnp.bfloat16),
        grid_spec=pltpu.PrefetchScalarGridSpec(
            num_scalar_prefetch=0,
            grid=(m_pad // tm,),
            in_specs=[
                pl.BlockSpec((tm_p, gk), lambda i: (i, 0)),         # masked patches
                pl.BlockSpec((tm_p, g), lambda i: (i, 0)),          # ratio column
                pl.BlockSpec((gk, width), lambda i: (0, 0)),        # block-diag weights
                pl.BlockSpec((g, width), lambda i: (0, 0)),         # repeat selector
                pl.BlockSpec((1, width), lambda i: (0, 0)),         # bias*scale row
                pl.BlockSpec((1, width), lambda i: (0, 0)),         # BN shift row
            ],
            out_specs=pl.BlockSpec((tm_p, width), lambda i: (i, 0)),
        ),
        compiler_params=pltpu.CompilerParams(
            dimension_semantics=("parallel",),
            vmem_limit_bytes=vmem_limit),
        cost_estimate=ce,
    )(pat, ratio, wbig, rsel, bscale_row, shift_row)

    out = out[:, :g * cout].reshape(m_pad, cout)[:m_rows]
    return out.reshape(n, h, wd, cout)                              # bf16 NHWC


# ------------------------------ module forward ------------------------------ #

def cond_pconv_block2d(image, mask, conditional, params, *, eps=1e-5, tm=2048):
    """image, mask, conditional: (N, C, H, W) float32 (NCHW, PyTorch layout)."""
    n, cin, h, w = image.shape
    cout = params['w1'].shape[0]

    img_nhwc = jnp.transpose(image, (0, 2, 3, 1)).astype(jnp.bfloat16)
    cond_nhwc = jnp.transpose(conditional, (0, 2, 3, 1))

    # conditional branch: (Conv3x3 -> BN -> ReLU) x 2
    c = _conv3x3_bn_relu(cond_nhwc, params['w1'], params['b1'], params['g1'],
                         params['be1'], params['m1'], params['v1'],
                         eps=eps, tm_max=tm)
    c = _conv3x3_bn_relu(c, params['w2'], params['b2'], params['g2'],
                         params['be2'], params['m2'], params['v2'],
                         eps=eps, tm_max=tm)
    cond_out_nhwc = c                                               # (N,H,W,Cout) bf16

    # stacked = cat((conditional_out, image), channel)
    stacked = jnp.concatenate([cond_out_nhwc, img_nhwc], axis=-1)   # (N,H,W,Ctot) bf16
    ctot = cout + cin
    slide_winsize = float(9 * ctot)

    # flat_mask = mask.any(dim=1); the repeated multi-channel mask is uniform, so
    # msum == conv(repeated_mask, ones) == Ctot * 3x3-window-sum(flat_mask).
    flat_mask = jnp.any(mask != 0.0, axis=1).astype(jnp.float32)    # (N, H, W)
    wsum = lax.reduce_window(flat_mask, 0.0, lax.add,
                             (1, 3, 3), (1, 1, 1), 'SAME')
    msum = float(ctot) * wsum                                       # (N, H, W)
    update_mask = (msum > 0.0).astype(jnp.float32)                  # == clip(msum,0,1)
    ratio = slide_winsize / (msum + 1e-8) * update_mask             # exact f32

    masked_stack = stacked * flat_mask[..., None].astype(jnp.bfloat16)

    img_out_nhwc = _pconv3x3_bn_relu(
        masked_stack, ratio.reshape(-1),
        params['wp'], params['bp'], params['gp'], params['bep'],
        params['mp'], params['vp'],
        eps=eps, tm_max=tm)

    image_out = jnp.transpose(img_out_nhwc, (0, 3, 1, 2)).astype(jnp.float32)
    conditional_out = jnp.transpose(cond_out_nhwc, (0, 3, 1, 2)).astype(jnp.float32)
    mask_out = jnp.broadcast_to(update_mask[:, None, :, :], (n, cout, h, w))
    return image_out, mask_out, conditional_out


# ------------------------------ pure-JAX reference -------------------------- #

def reference(image, mask, conditional, params, eps=1e-5):
    dn = ('NCHW', 'OIHW', 'NCHW')
    conv = lambda x, wt: lax.conv_general_dilated(x, wt, (1, 1), 'SAME',
                                                  dimension_numbers=dn)

    def bn(x, g, b, m, v):
        return ((x - m[None, :, None, None])
                / jnp.sqrt(v[None, :, None, None] + eps)
                * g[None, :, None, None] + b[None, :, None, None])

    p = params
    c = conv(conditional, p['w1']) + p['b1'][None, :, None, None]
    c = jax.nn.relu(bn(c, p['g1'], p['be1'], p['m1'], p['v1']))
    c = conv(c, p['w2']) + p['b2'][None, :, None, None]
    c = jax.nn.relu(bn(c, p['g2'], p['be2'], p['m2'], p['v2']))

    cin = image.shape[1]
    cout = p['w1'].shape[0]
    ctot = cin + cout
    stacked = jnp.concatenate([c, image], axis=1)
    flat = jnp.any(mask != 0.0, axis=1, keepdims=True).astype(jnp.float32)
    mrep = jnp.repeat(flat, ctot, axis=1)

    slide = float(ctot * 9)
    raw = conv(stacked * mrep, p['wp'])
    msum = conv(mrep, jnp.ones_like(p['wp']))
    upd = jnp.clip(msum, 0.0, 1.0)
    ratio = slide / (msum + 1e-8) * upd
    out = (raw * ratio + p['bp'][None, :, None, None]) * upd
    out = jax.nn.relu(bn(out, p['gp'], p['bep'], p['mp'], p['vp']))
    return out, upd, c


# ------------------------------------ main ----------------------------------- #

if __name__ == "__main__":
    key = jax.random.PRNGKey(0)
    keys = jax.random.split(key, 12)

    N, Cin, Cout, H, W = 2, 4, 8, 16, 16
    image = jax.random.normal(keys[0], (N, Cin, H, W), dtype=jnp.float32)
    mask = (jax.random.uniform(keys[1], (N, Cin, H, W)) > 0.4).astype(jnp.float32)
    conditional = jax.random.normal(keys[2], (N, Cin, H, W), dtype=jnp.float32)

    def bn_params(k, c):
        k1, k2, k3, k4 = jax.random.split(k, 4)
        return (1.0 + 0.1 * jax.random.normal(k1, (c,), jnp.float32),
                0.1 * jax.random.normal(k2, (c,), jnp.float32),
                0.05 * jax.random.normal(k3, (c,), jnp.float32),
                1.0 + 0.1 * jax.random.uniform(k4, (c,), jnp.float32))

    g1, be1, m1, v1 = bn_params(keys[6], Cout)
    g2, be2, m2, v2 = bn_params(keys[7], Cout)
    gp, bep, mp, vp = bn_params(keys[8], Cout)

    params = dict(
        w1=0.1 * jax.random.normal(keys[3], (Cout, Cin, 3, 3), jnp.float32),
        b1=0.1 * jax.random.normal(keys[9], (Cout,), jnp.float32),
        w2=0.1 * jax.random.normal(keys[4], (Cout, Cout, 3, 3), jnp.float32),
        b2=0.1 * jax.random.normal(keys[10], (Cout,), jnp.float32),
        wp=0.1 * jax.random.normal(keys[5], (Cout, Cin + Cout, 3, 3), jnp.float32),
        bp=0.1 * jax.random.normal(keys[11], (Cout,), jnp.float32),
        g1=g1, be1=be1, m1=m1, v1=v1,
        g2=g2, be2=be2, m2=m2, v2=v2,
        gp=gp, bep=bep, mp=mp, vp=vp,
    )

    img_out, mask_out, cond_out = cond_pconv_block2d(image, mask, conditional, params)
    jax.block_until_ready((img_out, mask_out, cond_out))

    ref_img, ref_mask, ref_cond = reference(image, mask, conditional, params)
    # bf16 GEMM operands / bf16 stores (f32 accumulation) vs f32 reference.
    np.testing.assert_allclose(np.asarray(cond_out), np.asarray(ref_cond),
                               rtol=5e-2, atol=5e-2)
    np.testing.assert_allclose(np.asarray(img_out), np.asarray(ref_img),
                               rtol=5e-2, atol=5e-2)
    np.testing.assert_allclose(np.asarray(mask_out), np.asarray(ref_mask),
                               rtol=1e-6, atol=1e-6)
    print("KERNEL_OK")
</pallas_src>

<mosaic_0001>
module attributes {stable_mosaic.version = 11 : i64} {
  func.func @_conv_bn_relu_kernel(%arg0: i32, %arg1: memref<16x576xbf16, #tpu.memory_space<vmem>>, %arg2: memref<576x128xbf16, #tpu.memory_space<vmem>>, %arg3: memref<1x128xf32, #tpu.memory_space<vmem>>, %arg4: memref<16x128xbf16, #tpu.memory_space<vmem>>) attributes {dimension_semantics = [#tpu.dimension_semantics<parallel>], iteration_bounds = array<i64: 2>, scalar_prefetch = 0 : i64, scratch_operands = 0 : i64, tpu.core_type = #tpu.core_type<tc>, window_params = [{transform_indices = @transform_0, window_bounds = array<i64: 16, 576>}, {pipeline_mode = #tpu.pipeline_mode<synchronous>, transform_indices = @transform_1, window_bounds = array<i64: 576, 128>}, {pipeline_mode = #tpu.pipeline_mode<synchronous>, transform_indices = @transform_2, window_bounds = array<i64: 1, 128>}, {transform_indices = @transform_3, window_bounds = array<i64: 16, 128>}]} {
    %c0 = arith.constant 0 : index
    %c0_0 = arith.constant 0 : index
    %0 = vector.load %arg1[%c0, %c0_0] : memref<16x576xbf16, #tpu.memory_space<vmem>>, vector<16x576xbf16>
    %c0_1 = arith.constant 0 : index
    %c0_2 = arith.constant 0 : index
    %1 = vector.load %arg2[%c0_1, %c0_2] : memref<576x128xbf16, #tpu.memory_space<vmem>>, vector<576x128xbf16>
    %cst = arith.constant dense<0.000000e+00> : vector<16x128xf32>
    %2 = tpu.matmul %0, %1, %cst {dimension_numbers = #tpu.dot_dimension_numbers<[1], [0], [0], [1], [0, 0, 1, 1], [], []>} : vector<16x576xbf16>, vector<576x128xbf16>, vector<16x128xf32> -> vector<16x128xf32>
    %c0_3 = arith.constant 0 : index
    %c0_4 = arith.constant 0 : index
    %3 = vector.load %arg3[%c0_3, %c0_4] : memref<1x128xf32, #tpu.memory_space<vmem>>, vector<1x128xf32>
    %4 = vector.broadcast %3 : vector<1x128xf32> to vector<16x128xf32>
    %5 = arith.addf %2, %4 : vector<16x128xf32>
    %cst_5 = arith.constant 0.000000e+00 : f32
    %6 = vector.broadcast %cst_5 : f32 to vector<16x128xf32>
    %7 = arith.maximumf %5, %6 : vector<16x128xf32>
    %8 = arith.truncf %7 : vector<16x128xf32> to vector<16x128xbf16>
    %c0_6 = arith.constant 0 : index
    %c0_7 = arith.constant 0 : index
    %9 = vector.load %arg4[%c0_6, %c0_7] : memref<16x128xbf16, #tpu.memory_space<vmem>>, vector<16x128xbf16>
    tpu.vector_store %arg4[%c0_6, %c0_7], %8 {strides = array<i32>} : memref<16x128xbf16, #tpu.memory_space<vmem>>, vector<16x128xbf16>,
    return
  }
  func.func @transform_0(%arg0: i32) -> (i32, i32) {
    %c0_i32 = arith.constant 0 : i32
    %c0_i32_0 = arith.constant 0 : i32
    return %arg0, %c0_i32 : i32, i32
  }
  func.func @transform_1(%arg0: i32) -> (i32, i32) {
    %c0_i32 = arith.constant 0 : i32
    %c0_i32_0 = arith.constant 0 : i32
    %c0_i32_1 = arith.constant 0 : i32
    return %c0_i32, %c0_i32_0 : i32, i32
  }
  func.func @transform_2(%arg0: i32) -> (i32, i32) {
    %c0_i32 = arith.constant 0 : i32
    %c0_i32_0 = arith.constant 0 : i32
    %c0_i32_1 = arith.constant 0 : i32
    return %c0_i32, %c0_i32_0 : i32, i32
  }
  func.func @transform_3(%arg0: i32) -> (i32, i32) {
    %c0_i32 = arith.constant 0 : i32
    %c0_i32_0 = arith.constant 0 : i32
    return %arg0, %c0_i32 : i32, i32
  }
}

</mosaic_0001>

<bundles_post_ra>
// kernel: tpu_custom_call.1
= control target key start
LH: loop header
LB: loop body
LE: loop exit
PB: predicated region body
PF: predicated region fallthrough
CT: control target
= control target key end

     0   :  { %8 = vsyncpa [#allocation3], 0  ;;  %s1321_s0 = inlined_call_operand.hbm [shape: bf16[32,576], index: 0, kind: input, shape index: {}]   ;;  %s1322_s1 = inlined_call_operand.hbm [shape: bf16[576,128], index: 1, kind: input, shape index: {}]   ;;  %s1323_s2 = inlined_call_operand.vmem [shape: f32[1,128], index: 2, kind: input, shape index: {}]   ;;  %s1324_s3 = inlined_call_operand.hbm [shape: bf16[32,128], index: 3, kind: output, shape index: {}]  }
   0x1   :  { %10 = vsyncpa [#allocation3 + $0x1], 0 }
   0x2   :  { %11 = vsyncpa [#allocation6], 0 }
   0x3   :  { %12 = vsyncpa [#allocation4], 0 }
   0x4   :  { %14 = vsyncpa [#allocation4 + $0x1], 0  ;;  %s1167_s12 = smov 0   ;;  %s1169_s13 = smov 0  }
   0x5   :  { %s1171_s14 = smov 0   ;;  %s1173_s15 = smov 0  }
   0x6 LB: > { %s1188_s16 = sadd.s32 4294967295, %s1138_s15   ;;  %s714_s17 = sadd.s32 4294967294, %s1138_s15   ;;  %s1138_s15 = sphi %s1173_s15, %s1334_s15   ;;  %s1134_s14 = sphi %s1171_s14, %s1333_s14   ;;  %s1130_s13 = sphi %s1169_s13, %s1332_s13   ;;  %s1126_s12 = sphi %s1167_s12, %s1331_s12  }
   0x7   : > { %p40_p0 = scmp.ne.s32.totalorder %s1130_s13, %s1126_s12  ;;  %p41_p1 = scmp.eq.s32.totalorder %s1188_s16, 0 }
   0x8   : > { %p106_p2 = scmp.eq.s32.totalorder %s1188_s16, 1  ;;  %p112_p3 = scmp.eq.s32.totalorder %s714_s17, 1 }
   0x9   : > { %p1197_p4 = por %p41_p1, %p40_p0  ;;  %p715_p5 = scmp.ge.s32.totalorder %s1138_s15, 1 }
   0xa   : > { %p1202_p6 = por %p112_p3, %p40_p0  ;;  %p119_p7 = scmp.lt.s32.totalorder %s1138_s15, 3 }
   0xb   : > { %s130_s22 = sshll.u32 %s1322_s1, 4  ;;  %s1140_s24 = smov [#allocation5]   ;;  %s131_s22 = int_to_ptr.hbm [resolvable:$true] %s130_s22 }
   0xc   : > { %p1210_p8 = pnand %p715_p5, %p119_p7  ;;  %s132_s25 = sshll.u32 %s1140_s24, 4  ;;  %s133_s25 = int_to_ptr.vmem [resolvable:$true] %s132_s25 }
   0xd   : > { %s1220_s26 = sadd.s32 1, %s1138_s15   ;;  %s1141_s27 = smov 64  }
   0xe   : > { %p952_p9 = pneg %p1210_p8  ;;  %s1142_s28 = smov 4  }
   0xf   : > { %s24_s29 = ssub.s32 %s1138_s15, %s1220_s26  ;;  %s27_s30 = sadd.s32 1, %s1134_s14 }
  0x10   : > { %p953_p10 = pnand %p952_p9, %p41_p1  ;;  %p25_p12 = scmp.eq.s32.totalorder %s24_s29, 0 }
  0x11   : > { %p34_p13 = scmp.ne.s32.totalorder %s1134_s14, %s1130_s13  ;;  %p35_p0 = scmp.eq.s32.totalorder %s1138_s15, 0 }
  0x12   : > { %955 = dma.hbm_to_vmem [thread:$0]  (!%p953_p10), %s131_s22, 4608, %s133_s25, [#allocation6], %s1141_s27, %s1141_s27, %s1142_s28  }
  0x13   : > { %p965_p3 = scmp.lt.s32.totalorder %s1138_s15, 2  ;;  %p36_p5 = por %p35_p0, %p34_p13 }
  0x14   : > { %s1230_s4 = scalar_select %p25_p12, %s1134_s14, %s27_s30  }
  0x15   : > { %p1234_p7 = por %p106_p2, %p34_p13  ;;  %s149_s6 = sand.u32 1, %s1134_s14  }
  0x16   : > { %s942_s7 = smul.u32 40, %s1138_s15  ;;  %p1243_p9 = pnand %p965_p3, %p36_p5 }
  0x17   : > { %s941_s8 = smul.u32 40, %s149_s6  ;;  %s150_s24 = scalar_lea.sflag [#allocation3], %s149_s6 }
  0x18   : > { %s159_s11 = scalar_lea.hbm %s1321_s0, %s942_s7  ;;  %p1042_p10 = pneg %p1243_p9 }
  0x19   : > { %s160_s20 = sshll.u32 %s159_s11, 4  ;;  %s153_s21 = scalar_lea.vmem [#allocation2], %s941_s8  ;;  %s161_s20 = int_to_ptr.hbm [resolvable:$true] %s160_s20 }
  0x1a   : > { %s162_s22 = sshll.u32 %s153_s21, 4  ;;  %s1038_s25 = sshra.s32 %s161_s20, 4  ;;  %s163_s22 = int_to_ptr.vmem [resolvable:$true] %s162_s22  ;;  %s1039_s25 = int_to_ptr.hbm [resolvable:$true] %s1038_s25 }
  0x1b   : > { %s1040_s27 = scalar_lea.hbm %s1039_s25, 40  ;;  %s1045_s30 = scalar_lea.hbm %s1321_s0, 80 }
  0x1c   : > { %p1041_p2 = scmp.ne.s32.totalorder %s1039_s25, %s1040_s27  ;;  %p1046_p0 = scmp.lt.s32.totalorder %s1039_s25, %s1321_s0 }
  0x1d   : > { %p1047_p3 = scmp.lt.s32.totalorder %s1045_s30, %s1040_s27 }
  0x1e   : > { %p1043_p12 = pnand %p1042_p10, %p1041_p2 }
  0x1f   : > { %p1048_p5 = por %p1047_p3, %p1046_p0 }
  0x20   : > { %p1044_p13 = pneg %p1043_p12 }
  0x22   : > { %p1049_p11 = pnand %p1048_p5, %p1044_p13 }
  0x24   : > { %1052 = shalt.err (!%p1049_p11)
}
  0x25   : > { %s1143_s6 = smov 320   ;;  %s1144_s8 = smov 20  }
  0x26   : > { %959 = dma.hbm_to_vmem [thread:$0]  (!%p1243_p9), %s161_s20, 640, %s163_s22, %s150_s24, %s1143_s6, %s1143_s6, %s1144_s8  }
  0x27   : > { %174 = sbr.rel (%p1210_p8) target bundleno = 239 (0xef), region = 32  ;;  %s1260_s10 = sand.u32 (!%p1210_p8), 1, %s1130_s13  }
  0x28   : > { %s943_s11 = smul.u32 (!%p1210_p8), 40, %s1260_s10  ;;  %s177_s21 = scalar_lea.sflag (!%p1210_p8), [#allocation3], %s1260_s10 }
  0x2a   : > { %s1264_s25 = scalar_lea.vmem (!%p1210_p8), [#allocation2], %s943_s11 }
  0x2c   : > { %1113 = dma.done.wait (%p1197_p4), %s177_s21, 640  }
  0x2d   : > { %1115 = vsyncadd (%p1197_p4), %s177_s21, 4294966656 }
  0x2e   : > { %1117 = dma.done.wait (%p41_p1), [#allocation6], 4608  }
  0x2f   : > { %1119 = vsyncadd (%p41_p1), [#allocation6], 4294962688  ;;  %v906_v0 = vld [vmem:[#allocation5 + $0x38] sm:$0xff]  ;;  %v905_v4 = vld [vmem:[#allocation5 + $0x30] sm:$0xff]  ;;  %vm535_vm0 = vcmask 523264   ;;  %s723_s17 = sshll.u32 %s1260_s10, 3 }
  0x30   : > { %v922_v1 = vld [vmem:[#allocation5 + $0xb8] sm:$0xff]  ;;  %539 = vmatpush.bf16.msra.mxu0 %v906_v0  ;;  %v921_v5 = vld [vmem:[#allocation5 + $0xb0] sm:$0xff]  ;;  %v904_v8 = vld [vmem:[#allocation5 + $0x28] sm:$0xff]  ;;  %s935_s20 = sshll.u32 %s1188_s16, 3  ;;  %s208_s28 = scalar_lea.vmem [#allocation7], %s723_s17 }
  0x31   : > { %v930_v2 = vld [vmem:[#allocation5 + $0xf8] sm:$0xff]  ;;  %567 = vmatpush.bf16.msra.mxu2 %v922_v1  ;;  %v929_v6 = vld [vmem:[#allocation5 + $0xf0] sm:$0xff]  ;;  %v920_v9 = vld [vmem:[#allocation5 + $0xa8] sm:$0xff]  ;;  %s627_s27 = scalar_lea.hbm %s1324_s3, %s935_s20  ;;  %s628_s29 = sshll.u32 %s208_s28, 4  ;;  %s629_s29 = int_to_ptr.vmem [resolvable:$true] %s628_s29 }
  0x32   : > { %v914_v3 = vld [vmem:[#allocation5 + $0x78] sm:$0xff]  ;;  %581 = vmatpush.bf16.msra.mxu3 %v930_v2  ;;  %v913_v7 = vld [vmem:[#allocation5 + $0x70] sm:$0xff]  ;;  %v928_v10 = vld [vmem:[#allocation5 + $0xe8] sm:$0xff]  ;;  %s630_s30 = sshll.u32 %s627_s27, 4  ;;  %s616_s16 = scalar_lea.sflag [#allocation4], %s1260_s10  ;;  %s631_s30 = int_to_ptr.hbm [resolvable:$true] %s630_s30 }
  0x33   : > { %553 = vmatpush.bf16.msra.mxu1 %v914_v3  ;;  %v912_v11 = vld [vmem:[#allocation5 + $0x68] sm:$0xff]  ;;  %v903_v12 = vld [vmem:[#allocation5 + $0x20] sm:$0xff]  ;;  %v902_v16 = vld [vmem:[#allocation5 + $0x18] sm:$0xff]  ;;  %s1082_s7 = sshra.s32 %s631_s30, 4  ;;  %s1088_s11 = scalar_lea.hbm %s1324_s3, 16  ;;  %s1083_s7 = int_to_ptr.hbm [resolvable:$true] %s1082_s7 }
  0x34   : > { %540 = vmatpush.bf16.msra.mxu0 %v905_v4  ;;  %v919_v13 = vld [vmem:[#allocation5 + $0xa0] sm:$0xff]  ;;  %v918_v17 = vld [vmem:[#allocation5 + $0x98] sm:$0xff]  ;;  %v901_v20 = vld [vmem:[#allocation5 + $0x10] sm:$0xff]  ;;  %s1084_s9 = scalar_lea.hbm %s1083_s7, 8  ;;  %p1089_p11 = scmp.lt.s32.totalorder %s1083_s7, %s1324_s3 }
  0x35   : > { %568 = vmatpush.bf16.msra.mxu2 %v921_v5  ;;  %v927_v14 = vld [vmem:[#allocation5 + $0xe0] sm:$0xff]  ;;  %v926_v18 = vld [vmem:[#allocation5 + $0xd8] sm:$0xff]  ;;  %v917_v21 = vld [vmem:[#allocation5 + $0x90] sm:$0xff]  ;;  %p1085_p1 = scmp.ne.s32.totalorder %s1083_s7, %s1084_s9  ;;  %p1090_p9 = scmp.lt.s32.totalorder %s1088_s11, %s1084_s9 }
  0x36   : > { %582 = vmatpush.bf16.msra.mxu3 %v929_v6  ;;  %v911_v15 = vld [vmem:[#allocation5 + $0x60] sm:$0xff]  ;;  %v910_v19 = vld [vmem:[#allocation5 + $0x58] sm:$0xff]  ;;  %v925_v22 = vld [vmem:[#allocation5 + $0xd0] sm:$0xff] }
  0x37   : > { %554 = vmatpush.bf16.msra.mxu1 %v913_v7  ;;  %v909_v23 = vld [vmem:[#allocation5 + $0x50] sm:$0xff]  ;;  %v900_v24 = vld [vmem:[#allocation5 + $0x8] sm:$0xff]  ;;  %v899_v28 = vld [vmem:[#allocation5] sm:$0xff]  ;;  %p1086_p4 = pnand %p1085_p1, %p1234_p7  ;;  %p1091_p2 = por %p1090_p9, %p1089_p11 }
  0x38   : > { %541 = vmatpush.bf16.msra.mxu0 %v904_v8  ;;  %v916_v25 = vld [vmem:[#allocation5 + $0x88] sm:$0xff]  ;;  %v915_v29 = vld [vmem:[#allocation5 + $0x80] sm:$0xff]  ;;  %v726_v32 = vld [vmem:[%s1264_s25] sm:$0xf] }
  0x39   : > { %569 = vmatpush.bf16.msra.mxu2 %v920_v9  ;;  %v924_v26 = vld [vmem:[#allocation5 + $0xc8] sm:$0xff]  ;;  %v923_v30 = vld [vmem:[#allocation5 + $0xc0] sm:$0xff]  ;;  %v736_v37 = vld [vmem:[%s1264_s25 + $0x1c] sm:$0xf0]  ;;  %p1087_p8 = pneg %p1086_p4 }
  0x3a   : > { %583 = vmatpush.bf16.msra.mxu3 %v928_v10  ;;  %v908_v27 = vld [vmem:[#allocation5 + $0x48] sm:$0xff]  ;;  %v907_v31 = vld [vmem:[#allocation5 + $0x40] sm:$0xff]  ;;  %v894_v38 = vld [vmem:[%s1264_s25 + $0x4] sm:$0xf] }
  0x3b   : > { %555 = vmatpush.bf16.msra.mxu1 %v912_v11  ;;  %v896_v33 = vld [vmem:[%s1264_s25 + $0x10] sm:$0xf0]  ;;  %v734_v34 = vld [vmem:[%s1264_s25 + $0x8] sm:$0xf]  ;;  %v897_v35 = vld [vmem:[%s1264_s25 + $0x18] sm:$0xf0]  ;;  %p1092_p10 = pnand %p1091_p2, %p1087_p8 }
  0x3c   : > { %542 = vmatpush.bf16.msra.mxu0 %v903_v12  ;;  %v895_v36 = vld [vmem:[%s1264_s25 + $0xc] sm:$0xf]  ;;  %v728_v39 = vld [vmem:[%s1264_s25 + $0x14] sm:$0xf0]  ;;  %v727_v41 = vor.u32 %v896_v33, %v726_v32  ;;  %v735_v42 = vor.u32 %v897_v35, %v734_v34  ;;  %v742_v48 = vld [vmem:[%s1264_s25 + $0x10] sm:$0xf] }
  0x3d   : > { %570 = vmatpush.bf16.msra.mxu2 %v919_v13  ;;  %v934_v40 = vld [vmem:[#allocation5 + $0x118] sm:$0xff]  ;;  %v739_v43 = vor.u32 %v895_v36, %v736_v37  ;;  %v731_v44 = vor.u32 %v894_v38, %v728_v39  ;;  %v933_v45 = vld [vmem:[#allocation5 + $0x110] sm:$0xff]  ;;  %v932_v46 = vld [vmem:[#allocation5 + $0x108] sm:$0xff] }
  0x3e   : > { %584 = vmatpush.bf16.msra.mxu3 %v927_v14  ;;  %v931_v47 = vld [vmem:[#allocation5 + $0x100] sm:$0xff]  ;;  %v898_v49 = vld [vmem:[%s1264_s25 + $0x20] sm:$0xf0]  ;;  %v1007_v54 = vld [vmem:[%s1323_s2] ss:$0 sm:$0xff] }
  0x3f   : > { %556 = vmatpush.bf16.msra.mxu1 %v911_v15  ;;  %v743_v50 = vor.u32 %v898_v49, %v742_v48 }
  0x40   : > { %543 = vmatpush.bf16.msra.mxu0 %v902_v16 }
  0x41   : > { %571 = vmatpush.bf16.msra.mxu2 %v918_v17 }
  0x42   : > { %585 = vmatpush.bf16.msra.mxu3 %v926_v18 }
  0x43   : > { %557 = vmatpush.bf16.msra.mxu1 %v910_v19 }
  0x44   : > { %544 = vmatpush.bf16.msra.mxu0 %v901_v20 }
  0x45   : > { %572 = vmatpush.bf16.msra.mxu2 %v917_v21 }
  0x46   : > { %586 = vmatpush.bf16.msra.mxu3 %v925_v22 }
  0x47   : > { %558 = vmatpush.bf16.msra.mxu1 %v909_v23 }
  0x48   : > { %545 = vmatpush.bf16.msra.mxu0 %v900_v24 }
  0x49   : > { %573 = vmatpush.bf16.msra.mxu2 %v916_v25 }
  0x4a   : > { %587 = vmatpush.bf16.msra.mxu3 %v924_v26 }
  0x4b   : > { %559 = vmatpush.bf16.msra.mxu1 %v908_v27 }
  0x4c   : > { %546 = vmatpush.bf16.msra.mxu0 %v899_v28 }
  0x4d   : > { %574 = vmatpush.bf16.msra.mxu2 %v915_v29 }
  0x4e   : > { %588 = vmatpush.bf16.msra.mxu3 %v923_v30 }
  0x4f   : > { %560 = vmatpush.bf16.msra.mxu1 %v907_v31  ;;  %547 = vmatmul.bf16.vlgmr.msra.gmra.mxu0 %v727_v41 }
  0x50   : > { %599 = vmatpush.bf16.msrb.mxu0 %v934_v40  ;;  %575 = vmatmul.bf16.vlgmr.msra.gmra.mxu2 %v735_v42 }
  0x51   : > { %589 = vmatmul.bf16.vlgmr.msra.gmra.mxu3 %v739_v43 }
  0x52   : > { %561 = vmatmul.bf16.vlgmr.msra.gmra.mxu1 %v731_v44 }
  0x54   : > { %600 = vmatpush.bf16.msrb.mxu0 %v933_v45 }
  0x58   : > { %601 = vmatpush.bf16.msrb.mxu0 %v932_v46 }
  0x5c   : > { %602 = vmatpush.bf16.msrb.mxu0 %v931_v47 }
  0x5f   : > { %888 = vmatmul.msk.bf16.vlgmr.msrb.gmra.mxu0 %vm535_vm0, %v743_v50 }
  0xcc   : > { %v548_v51 = vpop.f32.mrf.mxu0 }
  0xcd   : > { %v549_v56 = vadd.f32 %v1007_v54, %v548_v51 }
  0xcf   : > { %v562_v52 = vpop.f32.mrf.mxu1 }
  0xd0   : > { %v563_v60 = vadd.f32 %v562_v52, %v549_v56 }
  0xd3   : > { %v576_v53 = vpop.f32.mrf.mxu2 }
  0xd4   : > { %v550_v55 = vpop.f32.mrf.mxu0  ;;  %v590_v57 = vpop.f32.mrf.mxu3  ;;  %v577_v63 = vadd.f32 %v576_v53, %v563_v60 }
  0xd5   : > { %v551_v58 = vadd.f32 %v1007_v54, %v550_v55 }
  0xd6   : > { %v591_v2 = vadd.f32 %v590_v57, %v577_v63 }
  0xd7   : > { %v564_v59 = vpop.f32.mrf.mxu1 }
  0xd8   : > { %v565_v0 = vadd.f32 %v564_v59, %v551_v58 }
  0xdb   : > { %v578_v61 = vpop.f32.mrf.mxu2 }
  0xdc   : > { %v604_v62 = vpop.f32.mrf.mxu0  ;;  %v579_v1 = vadd.f32 %v578_v61, %v565_v0  ;;  %v592_v3 = vpop.f32.mrf.mxu3 }
  0xdd   : > { %v605_v5 = vadd.f32 %v604_v62, %v591_v2 }
  0xde   : > { %v593_v4 = vadd.f32 %v592_v3, %v579_v1 }
  0xdf   : > { %v609_v8 = vmax.f32 %v605_v5, 0.0 }
  0xe4   : > { %v606_v6 = vpop.f32.mrf.mxu0 }
  0xe5   : > { %v607_v7 = vadd.f32 %v606_v6, %v593_v4 }
  0xe7   : > { %v610_v9 = vmax.f32 %v607_v7, 0.0 }
  0xe9   : > { %v939_v10 = vpack.c.bf16 %v610_v9, %v609_v8 }
  0xeb   : > { %940 = vst [vmem:[%s208_s28] sm:$0xff] %v939_v10  }
  0xec   : > { %1095 = shalt.err (!%p1092_p10)
}
  0xed   : > { %s1145_s10 = smov 64   ;;  %s1146_s18 = smov 4  }
  0xee   : > { %950 = dma.vmem_to_hbm [thread:$0]  (%p1234_p7), %s629_s29, 128, %s631_s30, %s616_s16, %s1145_s10, %s1145_s10, %s1146_s18  }
  0xef PF: > { %s645_s23 = sand.u32 1, %s1126_s12   ;;  %p1330_p12 = scmp.ge.s32.totalorder %s1138_s15, 2 }
  0xf0   : > { %s646_s17 = scalar_lea.sflag [#allocation4], %s645_s23 }
  0xf1   : > { %p961_p13 = pnand %p1330_p12, %p1202_p6 }
  0xf3   : > { %p962_p0 = pneg %p961_p13 }
  0xf5   : > { %1121 = dma.done.wait (%p962_p0), %s646_s17, 128  }
  0xf6   : > { %1123 = vsyncadd (%p962_p0), %s646_s17, 4294967168  ;;  %p17_p3 = scmp.ge.s32.totalorder %s1220_s26, 4   ;;  %s1331_s12 = smov %s1130_s13 }
  0xf7   : > { %s1332_s13 = smov %s1134_s14  ;;  %s1333_s14 = smov %s1230_s4 }
  0xf8   : > { %s1334_s15 = smov %s1220_s26  ;;  %19 = sbr.rel (!%p17_p3) target bundleno = 6 (0x6), region = 81 }
  0xfd   :  { %652 = vsyncpa [#allocation3], 1 }
  0xfe   :  { %654 = vsyncpa [#allocation3 + $0x1], 1 }
  0xff   :  { %655 = vsyncpa [#allocation6], 1 }
 0x100   :  { %656 = vsyncpa [#allocation4], 1 }
 0x101   :  { %658 = vsyncpa [#allocation4 + $0x1], 1 }

</bundles_post_ra>
